<compile_context>
chip_gen: v5e
topology: v5e:2x2
jax: 0.10.0
libtpu: 0.0.40
codegen_flags: <defaults>
</compile_context>

<pallas_src>
import functools
import math

import jax
import jax.numpy as jnp
from jax import lax
from jax.experimental import pallas as pl
from jax.experimental.pallas import tpu as pltpu

EPS = 1e-12  # F.normalize eps


def _ema_kernel(feats_ref, bases_ref, out_ref, *, num_stages, batch_block,
                mxu_dtype):
    """EM attention for `batch_block` batch elements, fully resident in VMEM.

    feats_ref : (Bt, C, N)  features (f32, or bf16 when mxu_dtype=bf16)
    bases_ref : (K, C)      initial bases (f32, lane-dense), shared over batch
    out_ref   : (Bt, C, N)  reconstructed features
    """
    bases0 = bases_ref[...].astype(jnp.float32)                  # (K, C)

    for b in range(batch_block):                                 # unrolled, Bt small
        feats = feats_ref[b]                                     # (C, N)
        feats_mm = feats if mxu_dtype is None else feats.astype(mxu_dtype)

        bases = bases0                                           # (K, C)
        attention = None  # wrapper guarantees num_stages >= 1
        for _ in range(num_stages):
            bases_mm = bases if mxu_dtype is None else bases.astype(mxu_dtype)

            # attention[k, n] = sum_c bases[k, c] * feats[c, n]   (K, N)
            attention = lax.dot_general(
                bases_mm, feats_mm,
                dimension_numbers=(((1,), (0,)), ((), ())),
                preferred_element_type=jnp.float32)

            # Softmax over the bases axis K (cheap 8-row sublane reduce).
            m = jnp.max(attention, axis=0, keepdims=True)        # (1, N)
            e = jnp.exp(attention - m)
            s = jnp.sum(e, axis=0, keepdims=True)                # (1, N)
            attention = e * pl.reciprocal(s, approx=True)        # (K, N)

            # L1 normalize over the spatial axis N (torch dim=1 of (b, n, k)).
            # attention is post-softmax -> non-negative -> no abs needed.
            l1 = jnp.sum(attention, axis=1, keepdims=True)       # (K, 1)
            attn_normed = attention * pl.reciprocal(
                jnp.maximum(l1, EPS), approx=True)               # (K, N)

            attn_mm = (attn_normed if mxu_dtype is None
                       else attn_normed.astype(mxu_dtype))
            # bases[k, c] = sum_n attn_normed[k, n] * feats[c, n]   (K, C)
            # Both operands contract on their last (natural) axis.
            bases = lax.dot_general(
                attn_mm, feats_mm,
                dimension_numbers=(((1,), (1,)), ((), ())),
                preferred_element_type=jnp.float32)

            # L2 normalize over channels C (torch dim=1 of (b, c, k)).
            # C is the lane axis now -> cheap XLU lane reduce.
            ssq = jnp.sum(bases * bases, axis=1, keepdims=True)  # (K, 1)
            bases = bases * lax.rsqrt(jnp.maximum(ssq, EPS * EPS))

        # NOTE: the reconstruction intentionally uses the *softmaxed*
        # (pre-L1-normalized) attention — matches the PyTorch EMANet forward.
        bases_mm = bases if mxu_dtype is None else bases.astype(mxu_dtype)
        attn_mm = attention if mxu_dtype is None else attention.astype(mxu_dtype)
        # recon[c, n] = sum_k bases[k, c] * attention[k, n]        (C, N)
        recon = lax.dot_general(
            bases_mm, attn_mm,
            dimension_numbers=(((0,), (0,)), ((), ())),
            preferred_element_type=jnp.float32)

        out_ref[b] = recon.astype(out_ref.dtype)


def _vmem_capacity_bytes():
    """Physical VMEM of the current generation (conservative fallback)."""
    try:
        info = pltpu.get_tpu_info()
        cap = int(getattr(info, "vmem_capacity_bytes", 0))
        if cap > 0:
            return cap
    except Exception:
        pass
    return 64 << 20  # v7x-safe fallback


def _resident_bytes(batch_block, C, N, K, in_itemsize, out_itemsize):
    """Estimate of resident VMEM: double-buffered in/out blocks, the small
    bases block, and f32 temporaries for the unrolled EM chains."""
    in_block = batch_block * C * N * in_itemsize
    out_block = batch_block * C * N * out_itemsize
    temps = batch_block * (C * N + 2 * K * N + 2 * K * C) * 4   # f32 temporaries
    return 2 * in_block + 2 * out_block + 2 * K * C * 4 + temps + (1 << 20)


def _pick_batch_block(batch, C, N, K, in_itemsize, out_itemsize, budget):
    """Prefer 2 independent EM chains per grid step (enough to interleave the
    serial softmax/normalize epilogue with MXU work) while keeping the grid
    deep (>= 2 steps, for DMA overlap and v7x megacore) and within the VMEM
    budget.  Never maximize batch_block — it only multiplies VMEM/vreg
    pressure and code size beyond 2."""
    if (batch >= 4 and batch % 2 == 0
            and _resident_bytes(2, C, N, K, in_itemsize, out_itemsize) <= budget):
        return 2
    return 1


def _vmem_limit_bytes(est, budget):
    """Only override the default scoped limit (32 MiB) when the resident
    estimate needs it, and never exceed the generation's budget."""
    if est <= (32 << 20):
        return None
    return int(min(int(est * 1.25), budget))


def ema_module_forward(feats_nchw, bases_ck, *, num_stages, batch_block=None,
                       mxu_dtype=None, out_dtype=None, feats_buffer_count=None):
    """feats_nchw: (B, C, H, W), bases_ck: (C, K) f32 -> (B, C, H, W).

    mxu_dtype:  jnp.bfloat16 enables full-rate MXU + halved feats DMA/VMEM on
                *all* generations (v5e/v6e/v7x); accumulation and elementwise
                math remain f32.
    out_dtype:  set to jnp.bfloat16 to halve HBM writeback when downstream
                tolerates it (the kernel is HBM-bound at real EMANet sizes).
    feats_buffer_count: optional pipeline depth (>2) for the feats BlockSpec;
                worth a sweep on v7x with batch_block=1-2 and a deep grid.
    """
    assert num_stages >= 1, 'num_stages must be at least 1!'
    B, C, H, W = feats_nchw.shape
    N = H * W
    K = bases_ck.shape[1]
    out_dtype = feats_nchw.dtype if out_dtype is None else out_dtype

    feats = feats_nchw.reshape(B, C, N)
    if mxu_dtype is not None:
        feats = feats.astype(mxu_dtype)

    in_itemsize = jnp.dtype(feats.dtype).itemsize
    out_itemsize = jnp.dtype(out_dtype).itemsize
    # Headroom for compiler internal scratch (matters on v7x's 64 MiB VMEM).
    budget = _vmem_capacity_bytes() - (12 << 20)

    if batch_block is None:
        batch_block = _pick_batch_block(B, C, N, K, in_itemsize, out_itemsize,
                                        budget)
    assert B % batch_block == 0, "batch_block must divide batch"
    grid = (B // batch_block,)

    est = _resident_bytes(batch_block, C, N, K, in_itemsize, out_itemsize)
    cp_kwargs = dict(dimension_semantics=("parallel",))
    vmem_limit = _vmem_limit_bytes(est, budget)
    if vmem_limit is not None:
        cp_kwargs["vmem_limit_bytes"] = vmem_limit

    # Bases are kept lane-dense as (K, C) for the whole EM loop.
    bases_kc = bases_ck.astype(jnp.float32).T                    # (K, C)

    feats_spec_kwargs = {}
    if feats_buffer_count is not None and feats_buffer_count > 2:
        feats_spec_kwargs["pipeline_mode"] = pl.Buffered(feats_buffer_count)

    kernel = functools.partial(_ema_kernel, num_stages=num_stages,
                               batch_block=batch_block, mxu_dtype=mxu_dtype)

    out = pl.pallas_call(
        kernel,
        out_shape=jax.ShapeDtypeStruct((B, C, N), out_dtype),
        grid_spec=pltpu.PrefetchScalarGridSpec(
            num_scalar_prefetch=0,
            grid=grid,
            in_specs=[
                pl.BlockSpec((batch_block, C, N), lambda g: (g, 0, 0),
                             **feats_spec_kwargs),
                pl.BlockSpec((K, C), lambda g: (0, 0)),
            ],
            out_specs=pl.BlockSpec((batch_block, C, N), lambda g: (g, 0, 0)),
        ),
        compiler_params=pltpu.CompilerParams(**cp_kwargs),
    )(feats, bases_kc)

    return out.reshape(B, C, H, W)


def ema_module_reference(feats_nchw, bases_ck, *, num_stages):
    """Pure-JAX reference mirroring the PyTorch forward (eval mode), f32."""
    B, C, H, W = feats_nchw.shape
    N = H * W
    feats = feats_nchw.reshape(B, C, N)
    bases = jnp.broadcast_to(bases_ck[None], (B,) + bases_ck.shape)  # (B, C, K)
    attention = None
    for _ in range(num_stages):
        attention = jnp.einsum('bcn,bck->bnk', feats, bases)
        attention = jax.nn.softmax(attention, axis=2)
        l1 = jnp.sum(jnp.abs(attention), axis=1, keepdims=True)
        attention_normed = attention / jnp.maximum(l1, EPS)
        bases = jnp.einsum('bcn,bnk->bck', feats, attention_normed)
        l2 = jnp.sqrt(jnp.sum(bases * bases, axis=1, keepdims=True))
        bases = bases / jnp.maximum(l2, EPS)
    recon = jnp.einsum('bck,bnk->bcn', bases, attention)
    return recon.reshape(B, C, H, W)


def init_bases(key, channels, num_bases):
    """Deterministic equivalent of the module's __init__ buffer."""
    bases = jax.random.normal(key, (channels, num_bases), jnp.float32)
    bases = bases * math.sqrt(2.0 / num_bases)
    norm = jnp.sqrt(jnp.sum(bases * bases, axis=0, keepdims=True))  # L2 over C
    return bases / jnp.maximum(norm, EPS)


if __name__ == "__main__":
    B, C, H, W = 2, 32, 16, 16
    K = 8            # num_bases
    NUM_STAGES = 3
    # momentum = 0.1  (only used in the training-mode buffer update, not here)

    key = jax.random.PRNGKey(0)
    k_feats, k_bases = jax.random.split(key)

    feats = jax.random.normal(k_feats, (B, C, H, W), jnp.float32)
    bases = init_bases(k_bases, C, K)

    ref = ema_module_reference(feats, bases, num_stages=NUM_STAGES)

    # f32 MXU path. Tolerance is 2e-3 (not 1e-4) because the approximate EUP
    # reciprocal used for the softmax denominator feeds the reconstruction.
    out = ema_module_forward(feats, bases, num_stages=NUM_STAGES)
    out = jax.block_until_ready(out)
    assert out.shape == (B, C, H, W)
    assert jnp.allclose(out, ref, atol=2e-3, rtol=2e-3), \
        "f32 kernel mismatch vs reference"

    # bf16-MXU path (good on v5e/v6e/v7x) — loose sanity check only, since
    # bf16 operand rounding compounds over the EM iterations.
    out_bf16 = ema_module_forward(feats, bases, num_stages=NUM_STAGES,
                                  mxu_dtype=jnp.bfloat16)
    out_bf16 = jax.block_until_ready(out_bf16)
    assert out_bf16.shape == (B, C, H, W)
    assert jnp.allclose(out_bf16, ref, atol=1e-1, rtol=1e-1), \
        "bf16 MXU kernel mismatch vs reference"

    # bf16-I/O path (halves HBM writeback too).
    out_bf16_io = ema_module_forward(feats, bases, num_stages=NUM_STAGES,
                                     mxu_dtype=jnp.bfloat16,
                                     out_dtype=jnp.bfloat16)
    out_bf16_io = jax.block_until_ready(out_bf16_io)
    assert out_bf16_io.shape == (B, C, H, W)
    assert out_bf16_io.dtype == jnp.bfloat16
    assert jnp.allclose(out_bf16_io.astype(jnp.float32), ref,
                        atol=1e-1, rtol=1e-1), \
        "bf16 I/O kernel mismatch vs reference"

    print("KERNEL_OK")
</pallas_src>

<mosaic_0001>
module attributes {stable_mosaic.version = 11 : i64} {
  func.func @_ema_kernel(%arg0: i32, %arg1: memref<1x32x256xf32, #tpu.memory_space<vmem>>, %arg2: memref<8x32xf32, #tpu.memory_space<vmem>>, %arg3: memref<1x32x256xf32, #tpu.memory_space<vmem>>) attributes {dimension_semantics = [#tpu.dimension_semantics<parallel>], iteration_bounds = array<i64: 2>, scalar_prefetch = 0 : i64, scratch_operands = 0 : i64, tpu.core_type = #tpu.core_type<tc>, window_params = [{transform_indices = @transform_0, window_bounds = array<i64: 1, 32, 256>}, {pipeline_mode = #tpu.pipeline_mode<synchronous>, transform_indices = @transform_1, window_bounds = array<i64: 8, 32>}, {transform_indices = @transform_2, window_bounds = array<i64: 1, 32, 256>}]} {
    %c0 = arith.constant 0 : index
    %c0_0 = arith.constant 0 : index
    %0 = vector.load %arg2[%c0, %c0_0] : memref<8x32xf32, #tpu.memory_space<vmem>>, vector<8x32xf32>
    %c0_1 = arith.constant 0 : index
    %c0_2 = arith.constant 0 : index
    %c0_3 = arith.constant 0 : index
    %1 = vector.load %arg1[%c0_1, %c0_2, %c0_3] : memref<1x32x256xf32, #tpu.memory_space<vmem>>, vector<1x32x256xf32>
    %2 = vector.shape_cast %1 : vector<1x32x256xf32> to vector<32x256xf32>
    %cst = arith.constant dense<0.000000e+00> : vector<8x256xf32>
    %3 = tpu.matmul %0, %2, %cst {dimension_numbers = #tpu.dot_dimension_numbers<[1], [0], [0], [1], [0, 0, 1, 1], [], []>} : vector<8x32xf32>, vector<32x256xf32>, vector<8x256xf32> -> vector<8x256xf32>
    %cst_4 = arith.constant dense<0xFF800000> : vector<256xf32>
    %4 = vector.multi_reduction <maximumf>, %3, %cst_4 [0] : vector<8x256xf32> to vector<256xf32>
    %5 = vector.shape_cast %4 : vector<256xf32> to vector<1x256xf32>
    %6 = vector.broadcast %5 : vector<1x256xf32> to vector<8x256xf32>
    %7 = arith.subf %3, %6 : vector<8x256xf32>
    %8 = math.exp %7 : vector<8x256xf32>
    %cst_5 = arith.constant dense<0.000000e+00> : vector<256xf32>
    %9 = vector.multi_reduction <add>, %8, %cst_5 [0] : vector<8x256xf32> to vector<256xf32>
    %10 = vector.shape_cast %9 : vector<256xf32> to vector<1x256xf32>
    %11 = tpu.reciprocal %10 {approx = true} : vector<1x256xf32> -> vector<1x256xf32>
    %12 = vector.broadcast %11 : vector<1x256xf32> to vector<8x256xf32>
    %13 = arith.mulf %8, %12 : vector<8x256xf32>
    %cst_6 = arith.constant dense<0.000000e+00> : vector<8xf32>
    %14 = vector.multi_reduction <add>, %13, %cst_6 [1] : vector<8x256xf32> to vector<8xf32>
    %15 = vector.shape_cast %14 : vector<8xf32> to vector<8x1xf32>
    %cst_7 = arith.constant 9.99999996E-13 : f32
    %16 = vector.broadcast %cst_7 : f32 to vector<8x1xf32>
    %17 = arith.maximumf %15, %16 : vector<8x1xf32>
    %18 = tpu.reciprocal %17 {approx = true} : vector<8x1xf32> -> vector<8x1xf32>
    %19 = vector.broadcast %18 : vector<8x1xf32> to vector<8x256xf32>
    %20 = arith.mulf %13, %19 : vector<8x256xf32>
    %cst_8 = arith.constant dense<0.000000e+00> : vector<8x32xf32>
    %21 = tpu.matmul %20, %2, %cst_8 {dimension_numbers = #tpu.dot_dimension_numbers<[1], [1], [0], [0], [0, 0, 1, 0], [], []>} : vector<8x256xf32>, vector<32x256xf32>, vector<8x32xf32> -> vector<8x32xf32>
    %22 = arith.mulf %21, %21 : vector<8x32xf32>
    %cst_9 = arith.constant dense<0.000000e+00> : vector<8xf32>
    %23 = vector.multi_reduction <add>, %22, %cst_9 [1] : vector<8x32xf32> to vector<8xf32>
    %24 = vector.shape_cast %23 : vector<8xf32> to vector<8x1xf32>
    %cst_10 = arith.constant 1.000000e-24 : f32
    %25 = vector.broadcast %cst_10 : f32 to vector<8x1xf32>
    %26 = arith.maximumf %24, %25 : vector<8x1xf32>
    %27 = math.rsqrt %26 : vector<8x1xf32>
    %28 = vector.broadcast %27 : vector<8x1xf32> to vector<8x32xf32>
    %29 = arith.mulf %21, %28 : vector<8x32xf32>
    %cst_11 = arith.constant dense<0.000000e+00> : vector<8x256xf32>
    %30 = tpu.matmul %29, %2, %cst_11 {dimension_numbers = #tpu.dot_dimension_numbers<[1], [0], [0], [1], [0, 0, 1, 1], [], []>} : vector<8x32xf32>, vector<32x256xf32>, vector<8x256xf32> -> vector<8x256xf32>
    %cst_12 = arith.constant dense<0xFF800000> : vector<256xf32>
    %31 = vector.multi_reduction <maximumf>, %30, %cst_12 [0] : vector<8x256xf32> to vector<256xf32>
    %32 = vector.shape_cast %31 : vector<256xf32> to vector<1x256xf32>
    %33 = vector.broadcast %32 : vector<1x256xf32> to vector<8x256xf32>
    %34 = arith.subf %30, %33 : vector<8x256xf32>
    %35 = math.exp %34 : vector<8x256xf32>
    %cst_13 = arith.constant dense<0.000000e+00> : vector<256xf32>
    %36 = vector.multi_reduction <add>, %35, %cst_13 [0] : vector<8x256xf32> to vector<256xf32>
    %37 = vector.shape_cast %36 : vector<256xf32> to vector<1x256xf32>
    %38 = tpu.reciprocal %37 {approx = true} : vector<1x256xf32> -> vector<1x256xf32>
    %39 = vector.broadcast %38 : vector<1x256xf32> to vector<8x256xf32>
    %40 = arith.mulf %35, %39 : vector<8x256xf32>
    %cst_14 = arith.constant dense<0.000000e+00> : vector<8xf32>
    %41 = vector.multi_reduction <add>, %40, %cst_14 [1] : vector<8x256xf32> to vector<8xf32>
    %42 = vector.shape_cast %41 : vector<8xf32> to vector<8x1xf32>
    %cst_15 = arith.constant 9.99999996E-13 : f32
    %43 = vector.broadcast %cst_15 : f32 to vector<8x1xf32>
    %44 = arith.maximumf %42, %43 : vector<8x1xf32>
    %45 = tpu.reciprocal %44 {approx = true} : vector<8x1xf32> -> vector<8x1xf32>
    %46 = vector.broadcast %45 : vector<8x1xf32> to vector<8x256xf32>
    %47 = arith.mulf %40, %46 : vector<8x256xf32>
    %cst_16 = arith.constant dense<0.000000e+00> : vector<8x32xf32>
    %48 = tpu.matmul %47, %2, %cst_16 {dimension_numbers = #tpu.dot_dimension_numbers<[1], [1], [0], [0], [0, 0, 1, 0], [], []>} : vector<8x256xf32>, vector<32x256xf32>, vector<8x32xf32> -> vector<8x32xf32>
    %49 = arith.mulf %48, %48 : vector<8x32xf32>
    %cst_17 = arith.constant dense<0.000000e+00> : vector<8xf32>
    %50 = vector.multi_reduction <add>, %49, %cst_17 [1] : vector<8x32xf32> to vector<8xf32>
    %51 = vector.shape_cast %50 : vector<8xf32> to vector<8x1xf32>
    %cst_18 = arith.constant 1.000000e-24 : f32
    %52 = vector.broadcast %cst_18 : f32 to vector<8x1xf32>
    %53 = arith.maximumf %51, %52 : vector<8x1xf32>
    %54 = math.rsqrt %53 : vector<8x1xf32>
    %55 = vector.broadcast %54 : vector<8x1xf32> to vector<8x32xf32>
    %56 = arith.mulf %48, %55 : vector<8x32xf32>
    %cst_19 = arith.constant dense<0.000000e+00> : vector<8x256xf32>
    %57 = tpu.matmul %56, %2, %cst_19 {dimension_numbers = #tpu.dot_dimension_numbers<[1], [0], [0], [1], [0, 0, 1, 1], [], []>} : vector<8x32xf32>, vector<32x256xf32>, vector<8x256xf32> -> vector<8x256xf32>
    %cst_20 = arith.constant dense<0xFF800000> : vector<256xf32>
    %58 = vector.multi_reduction <maximumf>, %57, %cst_20 [0] : vector<8x256xf32> to vector<256xf32>
    %59 = vector.shape_cast %58 : vector<256xf32> to vector<1x256xf32>
    %60 = vector.broadcast %59 : vector<1x256xf32> to vector<8x256xf32>
    %61 = arith.subf %57, %60 : vector<8x256xf32>
    %62 = math.exp %61 : vector<8x256xf32>
    %cst_21 = arith.constant dense<0.000000e+00> : vector<256xf32>
    %63 = vector.multi_reduction <add>, %62, %cst_21 [0] : vector<8x256xf32> to vector<256xf32>
    %64 = vector.shape_cast %63 : vector<256xf32> to vector<1x256xf32>
    %65 = tpu.reciprocal %64 {approx = true} : vector<1x256xf32> -> vector<1x256xf32>
    %66 = vector.broadcast %65 : vector<1x256xf32> to vector<8x256xf32>
    %67 = arith.mulf %62, %66 : vector<8x256xf32>
    %cst_22 = arith.constant dense<0.000000e+00> : vector<8xf32>
    %68 = vector.multi_reduction <add>, %67, %cst_22 [1] : vector<8x256xf32> to vector<8xf32>
    %69 = vector.shape_cast %68 : vector<8xf32> to vector<8x1xf32>
    %cst_23 = arith.constant 9.99999996E-13 : f32
    %70 = vector.broadcast %cst_23 : f32 to vector<8x1xf32>
    %71 = arith.maximumf %69, %70 : vector<8x1xf32>
    %72 = tpu.reciprocal %71 {approx = true} : vector<8x1xf32> -> vector<8x1xf32>
    %73 = vector.broadcast %72 : vector<8x1xf32> to vector<8x256xf32>
    %74 = arith.mulf %67, %73 : vector<8x256xf32>
    %cst_24 = arith.constant dense<0.000000e+00> : vector<8x32xf32>
    %75 = tpu.matmul %74, %2, %cst_24 {dimension_numbers = #tpu.dot_dimension_numbers<[1], [1], [0], [0], [0, 0, 1, 0], [], []>} : vector<8x256xf32>, vector<32x256xf32>, vector<8x32xf32> -> vector<8x32xf32>
    %76 = arith.mulf %75, %75 : vector<8x32xf32>
    %cst_25 = arith.constant dense<0.000000e+00> : vector<8xf32>
    %77 = vector.multi_reduction <add>, %76, %cst_25 [1] : vector<8x32xf32> to vector<8xf32>
    %78 = vector.shape_cast %77 : vector<8xf32> to vector<8x1xf32>
    %cst_26 = arith.constant 1.000000e-24 : f32
    %79 = vector.broadcast %cst_26 : f32 to vector<8x1xf32>
    %80 = arith.maximumf %78, %79 : vector<8x1xf32>
    %81 = math.rsqrt %80 : vector<8x1xf32>
    %82 = vector.broadcast %81 : vector<8x1xf32> to vector<8x32xf32>
    %83 = arith.mulf %75, %82 : vector<8x32xf32>
    %cst_27 = arith.constant dense<0.000000e+00> : vector<32x256xf32>
    %84 = tpu.matmul %83, %67, %cst_27 {dimension_numbers = #tpu.dot_dimension_numbers<[0], [0], [1], [1], [0, 1, 1, 1], [], []>} : vector<8x32xf32>, vector<8x256xf32>, vector<32x256xf32> -> vector<32x256xf32>
    %c0_28 = arith.constant 0 : index
    %c0_29 = arith.constant 0 : index
    %c0_30 = arith.constant 0 : index
    %85 = vector.load %arg3[%c0_28, %c0_29, %c0_30] : memref<1x32x256xf32, #tpu.memory_space<vmem>>, vector<1x32x256xf32>
    %86 = vector.shape_cast %85 : vector<1x32x256xf32> to vector<32x256xf32>
    %87 = vector.shape_cast %84 : vector<32x256xf32> to vector<1x32x256xf32>
    tpu.vector_store %arg3[%c0_28, %c0_29, %c0_30], %87 {strides = array<i32>} : memref<1x32x256xf32, #tpu.memory_space<vmem>>, vector<1x32x256xf32>,
    return
  }
  func.func @transform_0(%arg0: i32) -> (i32, i32, i32) {
    %c0_i32 = arith.constant 0 : i32
    %c0_i32_0 = arith.constant 0 : i32
    %c0_i32_1 = arith.constant 0 : i32
    return %arg0, %c0_i32, %c0_i32_0 : i32, i32, i32
  }
  func.func @transform_1(%arg0: i32) -> (i32, i32) {
    %c0_i32 = arith.constant 0 : i32
    %c0_i32_0 = arith.constant 0 : i32
    %c0_i32_1 = arith.constant 0 : i32
    return %c0_i32, %c0_i32_0 : i32, i32
  }
  func.func @transform_2(%arg0: i32) -> (i32, i32, i32) {
    %c0_i32 = arith.constant 0 : i32
    %c0_i32_0 = arith.constant 0 : i32
    %c0_i32_1 = arith.constant 0 : i32
    return %arg0, %c0_i32, %c0_i32_0 : i32, i32, i32
  }
}

</mosaic_0001>

<bundles_post_ra>
// kernel: tpu_custom_call.1
= control target key start
LH: loop header
LB: loop body
LE: loop exit
PB: predicated region body
PF: predicated region fallthrough
CT: control target
= control target key end

     0   :  { %7 = vsyncpa [#allocation3], 0  ;;  %s1320_s0 = inlined_call_operand.hbm [shape: f32[2,32,256], index: 0, kind: input, shape index: {}]   ;;  %s1321_s1 = inlined_call_operand.hbm [shape: f32[8,32], index: 1, kind: input, shape index: {}]   ;;  %s1322_s2 = inlined_call_operand.hbm [shape: f32[2,32,256], index: 2, kind: output, shape index: {}]  }
   0x1   :  { %9 = vsyncpa [#allocation3 + $0x1], 0 }
   0x2   :  { %10 = vsyncpa [#allocation6], 0 }
   0x3   :  { %11 = vsyncpa [#allocation4], 0 }
   0x4   :  { %13 = vsyncpa [#allocation4 + $0x1], 0  ;;  %s1101_s9 = smov 0   ;;  %s1103_s10 = smov 0  }
   0x5   :  { %s1105_s11 = smov 0   ;;  %s1107_s12 = smov 0  }
   0x6 LB: > { %s1122_s13 = sadd.s32 4294967295, %s1079_s12   ;;  %s819_s14 = sadd.s32 4294967294, %s1079_s12   ;;  %s1079_s12 = sphi %s1107_s12, %s1333_s12   ;;  %s1075_s11 = sphi %s1105_s11, %s1332_s11   ;;  %s1071_s10 = sphi %s1103_s10, %s1331_s10   ;;  %s1067_s9 = sphi %s1101_s9, %s1330_s9  }
   0x7   : > { %s1126_s15 = sadd.s32 1, %s1079_s12   ;;  %s26_s16 = sadd.s32 1, %s1075_s11 }
   0x8   : > { %s23_s17 = ssub.s32 %s1079_s12, %s1126_s15  ;;  %p33_p0 = scmp.ne.s32.totalorder %s1075_s11, %s1071_s10 }
   0x9   : > { %p24_p1 = scmp.eq.s32.totalorder %s23_s17, 0  ;;  %p34_p2 = scmp.eq.s32.totalorder %s1079_s12, 0 }
   0xa   : > { %p39_p3 = scmp.ne.s32.totalorder %s1071_s10, %s1067_s9  ;;  %p40_p4 = scmp.eq.s32.totalorder %s1122_s13, 0 }
   0xb   : > { %s1138_s18 = scalar_select %p24_p1, %s1075_s11, %s26_s16  }
   0xc   : > { %p1140_p5 = por %p34_p2, %p33_p0  ;;  %p1146_p6 = por %p40_p4, %p39_p3 }
   0xd   : > { %p84_p7 = scmp.eq.s32.totalorder %s1122_s13, 1  ;;  %p90_p8 = scmp.eq.s32.totalorder %s819_s14, 1 }
   0xe   : > { %p820_p9 = scmp.ge.s32.totalorder %s1079_s12, 1  ;;  %p97_p10 = scmp.lt.s32.totalorder %s1079_s12, 3 }
   0xf   : > { %p1153_p11 = por %p84_p7, %p33_p0  ;;  %p1157_p12 = por %p90_p8, %p39_p3 }
  0x10   : > { %p1161_p13 = pnand %p820_p9, %p97_p10  ;;  %s109_s26 = sshll.u32 %s1321_s1, 4  ;;  %s110_s26 = int_to_ptr.hbm [resolvable:$true] %s109_s26 }
  0x11   : > { %s1081_s27 = smov [#allocation5]   ;;  %p872_p3 = scmp.lt.s32.totalorder %s1079_s12, 2 }
  0x12   : > { %p859_p1 = pneg %p1161_p13  ;;  %s111_s28 = sshll.u32 %s1081_s27, 4  ;;  %s112_s28 = int_to_ptr.vmem [resolvable:$true] %s111_s28 }
  0x13   : > { %s122_s29 = sand.u32 1, %s1075_s11   ;;  %p1177_p7 = pnand %p872_p3, %p1140_p5 }
  0x14   : > { %p860_p2 = pnand %p859_p1, %p40_p4  ;;  %s823_s3 = sshll.u32 %s122_s29, 6 }
  0x15   : > { %s849_s4 = sshll.u32 %s1079_s12, 6  ;;  %s126_s14 = scalar_lea.vmem [#allocation2], %s823_s3 }
  0x16   : > { %862 = dma.hbm_to_vmem [thread:$0]  (!%p860_p2), %s110_s26, 128, %s112_s28, [#allocation6]  }
  0x17   : > { %s131_s7 = scalar_lea.hbm %s1320_s0, %s849_s4  ;;  %s134_s16 = sshll.u32 %s126_s14, 4  ;;  %s135_s16 = int_to_ptr.vmem [resolvable:$true] %s134_s16 }
  0x18   : > { %s132_s8 = sshll.u32 %s131_s7, 4  ;;  %s123_s17 = scalar_lea.sflag [#allocation3], %s122_s29  ;;  %s133_s8 = int_to_ptr.hbm [resolvable:$true] %s132_s8 }
  0x19   : > { %s979_s24 = sshra.s32 %s133_s8, 4  ;;  %p983_p8 = pneg %p1177_p7  ;;  %s980_s24 = int_to_ptr.hbm [resolvable:$true] %s979_s24 }
  0x1a   : > { %s981_s19 = scalar_lea.hbm %s980_s24, 64  ;;  %s986_s27 = scalar_lea.hbm %s1320_s0, 128 }
  0x1b   : > { %p982_p5 = scmp.ne.s32.totalorder %s980_s24, %s981_s19  ;;  %p987_p1 = scmp.lt.s32.totalorder %s980_s24, %s1320_s0 }
  0x1c   : > { %p988_p2 = scmp.lt.s32.totalorder %s986_s27, %s981_s19 }
  0x1d   : > { %p984_p9 = pnand %p983_p8, %p982_p5 }
  0x1e   : > { %p989_p3 = por %p988_p2, %p987_p1 }
  0x1f   : > { %p985_p10 = pneg %p984_p9 }
  0x21   : > { %p990_p0 = pnand %p989_p3, %p985_p10 }
  0x23   : > { %993 = shalt.err (!%p990_p0)
}
  0x24   : > { %s1082_s29 = smov 256   ;;  %s1083_s3 = smov 16  }
  0x25   : > { %866 = dma.hbm_to_vmem [thread:$0]  (!%p1177_p7), %s133_s8, 1024, %s135_s16, %s123_s17, %s1082_s29, %s1082_s29, %s1083_s3  }
  0x26   : > { %146 = sbr.rel (%p1161_p13) target bundleno = 2105 (0x839), region = 28  ;;  %s1198_s5 = sand.u32 (!%p1161_p13), 1, %s1071_s10  }
  0x27   : > { %s827_s6 = sshll.u32 (!%p1161_p13), %s1198_s5, 6  ;;  %s149_s7 = scalar_lea.sflag (!%p1161_p13), [#allocation3], %s1198_s5 }
  0x28   : > { %s152_s14 = scalar_lea.vmem (!%p1161_p13), [#allocation2], %s827_s6 }
  0x2b   : > { %1054 = dma.done.wait (%p1146_p6), %s149_s7, 1024  }
  0x2c   : > { %1056 = vsyncadd (%p1146_p6), %s149_s7, 4294966272 }
  0x2d   : > { %1058 = dma.done.wait (%p40_p4), [#allocation6], 128  }
  0x2e   : > { %1060 = vsyncadd (%p40_p4), [#allocation6], 4294967168  ;;  %v1212_v0 = vld [vmem:[%s152_s14 + $0x30] sm:$0xff]  ;;  %v1214_v1 = vld [vmem:[%s152_s14 + $0x38] sm:$0xff]  ;;  %vm188_vm0 = vcmask 261120   ;;  %vm641_vm10 = vcmask 64512  }
  0x2f   : > { %v1216_v2 = vld [vmem:[%s152_s14 + $0x20] sm:$0xff]  ;;  %204 = vmatpush.msra.mxu2 %v1212_v0  ;;  %224 = vmatpush.msra.mxu3 %v1214_v1  ;;  %v1220_v3 = vld [vmem:[%s152_s14 + $0x28] sm:$0xff]  ;;  %v1222_v4 = vld [vmem:[%s152_s14 + $0x10] sm:$0xff]  ;;  %s178_s20 = scalar_lea.vmem [#allocation7], %s827_s6  ;;  %s850_s23 = sshll.u32 %s1122_s13, 6 }
  0x30   : > { %v1224_v5 = vld [vmem:[%s152_s14 + $0x18] sm:$0xff]  ;;  %344 = vmatpush.msra.mxu0 %v1212_v0  ;;  %364 = vmatpush.msra.mxu1 %v1214_v1  ;;  %v1230_v6 = vld [vmem:[%s152_s14] sm:$0xff]  ;;  %v1232_v7 = vld [vmem:[%s152_s14 + $0x8] sm:$0xff]  ;;  %s732_s16 = scalar_lea.hbm %s1322_s2, %s850_s23  ;;  %s733_s17 = sshll.u32 %s178_s20, 4  ;;  %s734_s17 = int_to_ptr.vmem [resolvable:$true] %s733_s17 }
  0x31   : > { %205 = vmatpush.msra.mxu2 %v1216_v2  ;;  %225 = vmatpush.msra.mxu3 %v1220_v3  ;;  %v179_v8 = vld [vmem:[#allocation5] sm:$0xff]  ;;  %s735_s24 = sshll.u32 %s732_s16, 4  ;;  %s721_s19 = scalar_lea.sflag [#allocation4], %s1198_s5  ;;  %s736_s24 = int_to_ptr.hbm [resolvable:$true] %s735_s24 }
  0x32   : > { %345 = vmatpush.msra.mxu0 %v1216_v2  ;;  %365 = vmatpush.msra.mxu1 %v1220_v3  ;;  %s1023_s25 = sshra.s32 %s736_s24, 4  ;;  %s1029_s28 = scalar_lea.hbm %s1322_s2, 128  ;;  %s1024_s25 = int_to_ptr.hbm [resolvable:$true] %s1023_s25 }
  0x33   : > { %206 = vmatpush.msra.mxu2 %v1222_v4  ;;  %226 = vmatpush.msra.mxu3 %v1224_v5  ;;  %s1025_s13 = scalar_lea.hbm %s1024_s25, 64  ;;  %p1030_p0 = scmp.lt.s32.totalorder %s1024_s25, %s1322_s2 }
  0x34   : > { %346 = vmatpush.msra.mxu0 %v1222_v4  ;;  %366 = vmatpush.msra.mxu1 %v1224_v5  ;;  %p1026_p4 = scmp.ne.s32.totalorder %s1024_s25, %s1025_s13  ;;  %p1031_p7 = scmp.lt.s32.totalorder %s1029_s28, %s1025_s13 }
  0x35   : > { %207 = vmatpush.msra.mxu2 %v1230_v6  ;;  %227 = vmatpush.msra.mxu3 %v1232_v7 }
  0x36   : > { %830 = vmatmul.msk.f32.vlgmr.msra.gmra.mxu2 %vm188_vm0, %v179_v8  ;;  %831 = vmatmul.msk.f32.vlgmr.msra.gmra.mxu3 %vm188_vm0, %v179_v8  ;;  %p1027_p6 = pnand %p1026_p4, %p1153_p11  ;;  %p1032_p5 = por %p1031_p7, %p1030_p0 }
  0x37   : > { %285 = vmatpush.xpose.msrb.mxu2 %v1212_v0  ;;  %305 = vmatpush.xpose.msrb.mxu3 %v1214_v1 }
  0x38   : > { %347 = vmatpush.msra.mxu0 %v1230_v6  ;;  %367 = vmatpush.msra.mxu1 %v1232_v7  ;;  %p1028_p13 = pneg %p1027_p6 }
  0x3a   : > { %425 = vmatpush.xpose.msrb.mxu0 %v1212_v0  ;;  %445 = vmatpush.xpose.msrb.mxu1 %v1214_v1  ;;  %p1033_p8 = pnand %p1032_p5, %p1028_p13 }
  0x3b   : > { %286 = vmatpush.xpose.msrb.mxu2 %v1216_v2  ;;  %306 = vmatpush.xpose.msrb.mxu3 %v1220_v3 }
  0x3e   : > { %426 = vmatpush.xpose.msrb.mxu0 %v1216_v2  ;;  %446 = vmatpush.xpose.msrb.mxu1 %v1220_v3 }
  0x3f   : > { %287 = vmatpush.xpose.msrb.mxu2 %v1222_v4  ;;  %307 = vmatpush.xpose.msrb.mxu3 %v1224_v5 }
  0x42   : > { %427 = vmatpush.xpose.msrb.mxu0 %v1222_v4  ;;  %447 = vmatpush.xpose.msrb.mxu1 %v1224_v5 }
  0x43   : > { %288 = vmatpush.xpose.msrb.mxu2 %v1230_v6  ;;  %308 = vmatpush.xpose.msrb.mxu3 %v1232_v7 }
  0x46   : > { %428 = vmatpush.xpose.msrb.mxu0 %v1230_v6  ;;  %448 = vmatpush.xpose.msrb.mxu1 %v1232_v7 }
  0x47   : > { %484 = vmatpush.msra.mxu2 %v1212_v0  ;;  %504 = vmatpush.msra.mxu3 %v1214_v1 }
  0x49   : > { %485 = vmatpush.msra.mxu2 %v1216_v2  ;;  %505 = vmatpush.msra.mxu3 %v1220_v3 }
  0x4b   : > { %486 = vmatpush.msra.mxu2 %v1222_v4  ;;  %506 = vmatpush.msra.mxu3 %v1224_v5 }
  0x4d   : > { %487 = vmatpush.msra.mxu2 %v1230_v6  ;;  %507 = vmatpush.msra.mxu3 %v1232_v7 }
  0xb9   : > { %v209_v9 = vpop.f32.mrf.mxu2  ;;  %v229_v10 = vpop.f32.mrf.mxu3 }
  0xba   : > { %v232_v11 = vrot.slane %v209_v9, 4  ;;  %v238_v12 = vrot.slane %v229_v10, 4 }
  0xbc   : > { %v233_v13 = vmax.f32 %v209_v9, %v232_v11  ;;  %v239_v14 = vmax.f32 %v229_v10, %v238_v12 }
  0xbe   : > { %v234_v15 = vrot.slane %v233_v13, 2  ;;  %v240_v16 = vrot.slane %v239_v14, 2 }
  0xc0   : > { %v235_v17 = vmax.f32 %v233_v13, %v234_v15  ;;  %v241_v18 = vmax.f32 %v239_v14, %v240_v16 }
  0xc2   : > { %v236_v19 = vrot.slane %v235_v17, 1  ;;  %v242_v20 = vrot.slane %v241_v18, 1 }
  0xc4   : > { %v237_v21 = vmax.f32 %v235_v17, %v236_v19  ;;  %v243_v22 = vmax.f32 %v241_v18, %v242_v20 }
  0xc6   : > { %v244_v23 = vsub.f32 %v209_v9, %v237_v21  ;;  %v245_v24 = vsub.f32 %v229_v10, %v243_v22 }
  0xc8   : > { %v246_v25 = vmul.f32 1.442695, %v244_v23  ;;  %v248_v26 = vmul.f32 1.442695, %v245_v24 }
  0xca   : > { %913 = vpow2.f32 %v246_v25 }
  0xcb   : > { %915 = vpow2.f32 %v248_v26 }
  0xd0   : > { %v914_v27 = vpop.eup %913 }
  0xd1   : > { %v916_v28 = vpop.eup %915  ;;  %v250_v29 = vrot.slane %v914_v27, 4 }
  0xd2   : > { %v256_v30 = vrot.slane %v916_v28, 4 }
  0xd3   : > { %v251_v31 = vadd.f32 %v914_v27, %v250_v29 }
  0xd4   : > { %v257_v32 = vadd.f32 %v916_v28, %v256_v30 }
  0xd5   : > { %v252_v33 = vrot.slane %v251_v31, 2 }
  0xd6   : > { %v258_v34 = vrot.slane %v257_v32, 2 }
  0xd7   : > { %v253_v35 = vadd.f32 %v252_v33, %v251_v31 }
  0xd8   : > { %v259_v36 = vadd.f32 %v258_v34, %v257_v32 }
  0xd9   : > { %v254_v37 = vrot.slane %v253_v35, 1 }
  0xda   : > { %v260_v38 = vrot.slane %v259_v36, 1 }
  0xdb   : > { %v255_v39 = vadd.f32 %v254_v37, %v253_v35 }
  0xdc   : > { %v261_v40 = vadd.f32 %v260_v38, %v259_v36 }
  0xdd   : > { %917 = vrcp.f32 %v255_v39 }
  0xde   : > { %919 = vrcp.f32 %v261_v40 }
  0xe3   : > { %v918_v41 = vpop.eup %917 }
  0xe4   : > { %v920_v42 = vpop.eup %919  ;;  %v264_v43 = vmul.f32 %v918_v41, %v914_v27 }
  0xe5   : > { %v265_v44 = vmul.f32 %v920_v42, %v916_v28 }
  0xe7   : > { %v266_v45 = vadd.f32 %v265_v44, %v264_v43 }
  0xe9   : > { %267 = vadd.xlane.f32.xlu0 %v266_v45 }
 0x15c   : > { %v268_v46 = vpop.xlane.xlu0 %267 }
 0x15d   : > { %v269_v47 = vmax.f32 %v268_v46, 1e-12 }
 0x15f   : > { %921 = vrcp.f32 %v269_v47 }
 0x165   : > { %v922_v48 = vpop.eup %921 }
 0x166   : > { %v271_v49 = vmul.f32 %v922_v48, %v264_v43  ;;  %v272_v50 = vmul.f32 %v922_v48, %v265_v44 }
 0x168   : > { %289 = vmatmul.f32.vlgmr.msrb.gmra.mxu2 %v271_v49  ;;  %309 = vmatmul.f32.vlgmr.msrb.gmra.mxu3 %v272_v50 }
 0x169   : > { %565 = vmatpush.xpose.msrb.mxu2 %v1212_v0  ;;  %585 = vmatpush.xpose.msrb.mxu3 %v1214_v1 }
 0x16d   : > { %566 = vmatpush.xpose.msrb.mxu2 %v1216_v2  ;;  %586 = vmatpush.xpose.msrb.mxu3 %v1220_v3 }
 0x171   : > { %567 = vmatpush.xpose.msrb.mxu2 %v1222_v4  ;;  %587 = vmatpush.xpose.msrb.mxu3 %v1224_v5 }
 0x175   : > { %568 = vmatpush.xpose.msrb.mxu2 %v1230_v6  ;;  %588 = vmatpush.xpose.msrb.mxu3 %v1232_v7 }
 0x1eb   : > { %v290_v51 = vpop.f32.mrf.mxu2  ;;  %v310_v52 = vpop.f32.mrf.mxu3 }
 0x1ec   : > { %v311_v53 = vadd.f32 %v310_v52, %v290_v51 }
 0x1ee   : > { %v313_v54 = vmul.f32 %v311_v53, %v311_v53 }
 0x1f0   : > { %v314_v55 = vsel %vm188_vm0, %v313_v54, 0.0 }
 0x1f1   : > { %315 = vadd.xlane.f32.xlu0 %v314_v55 }
 0x264   : > { %v316_v56 = vpop.xlane.xlu0 %315 }
 0x265   : > { %v317_v57 = vmax.f32 %v316_v56, 1e-24 }
 0x267   : > { %923 = vrsqrt.f32 %v317_v57  ;;  %vm324_vm2 = vweird.f32 %v317_v57 }
 0x26d   : > { %v924_v58 = vpop.eup %923 }
 0x26e   : > { %v319_v59 = vmul.f32 %v924_v58, %v317_v57  ;;  %vm325_vm1 = vweird.f32 %v924_v58 }
 0x26f   : > { %vm326_vm3 = vmor %vm324_vm2, %vm325_vm1 }
 0x270   : > { %v320_v60 = vmul.f32 %v924_v58, %v319_v59 }
 0x272   : > { %v321_v61 = vmul.f32 0.5, %v320_v60 }
 0x274   : > { %v322_v62 = vsub.f32 1.5, %v321_v61 }
 0x276   : > { %v323_v63 = vmul.f32 %v924_v58, %v322_v62 }
 0x278   : > { %v327_v0 = vsel %vm326_vm3, %v924_v58, %v323_v63 }
 0x279   : > { %v328_v1 = vmul.f32 %v327_v0, %v311_v53 }
 0x27b   : > { %832 = vmatmul.msk.f32.vlgmr.msra.gmra.mxu0 %vm188_vm0, %v328_v1  ;;  %833 = vmatmul.msk.f32.vlgmr.msra.gmra.mxu1 %vm188_vm0, %v328_v1 }
 0x2f8   : > { %v349_v2 = vpop.f32.mrf.mxu0  ;;  %v369_v3 = vpop.f32.mrf.mxu1 }
 0x2f9   : > { %v372_v4 = vrot.slane %v349_v2, 4  ;;  %v378_v5 = vrot.slane %v369_v3, 4 }
 0x2fb   : > { %v373_v6 = vmax.f32 %v349_v2, %v372_v4  ;;  %v379_v7 = vmax.f32 %v369_v3, %v378_v5 }
 0x2fd   : > { %v374_v8 = vrot.slane %v373_v6, 2  ;;  %v380_v9 = vrot.slane %v379_v7, 2 }
 0x2ff   : > { %v375_v10 = vmax.f32 %v373_v6, %v374_v8  ;;  %v381_v11 = vmax.f32 %v379_v7, %v380_v9 }
 0x301   : > { %v376_v12 = vrot.slane %v375_v10, 1  ;;  %v382_v13 = vrot.slane %v381_v11, 1 }
 0x303   : > { %v377_v14 = vmax.f32 %v375_v10, %v376_v12  ;;  %v383_v15 = vmax.f32 %v381_v11, %v382_v13 }
 0x305   : > { %v384_v16 = vsub.f32 %v349_v2, %v377_v14  ;;  %v385_v17 = vsub.f32 %v369_v3, %v383_v15 }
 0x307   : > { %v386_v18 = vmul.f32 1.442695, %v384_v16  ;;  %v388_v19 = vmul.f32 1.442695, %v385_v17 }
 0x309   : > { %925 = vpow2.f32 %v386_v18 }
 0x30a   : > { %927 = vpow2.f32 %v388_v19 }
 0x30f   : > { %v926_v20 = vpop.eup %925 }
 0x310   : > { %v928_v21 = vpop.eup %927  ;;  %v390_v22 = vrot.slane %v926_v20, 4 }
 0x311   : > { %v396_v23 = vrot.slane %v928_v21, 4 }
 0x312   : > { %v391_v24 = vadd.f32 %v926_v20, %v390_v22 }
 0x313   : > { %v397_v25 = vadd.f32 %v928_v21, %v396_v23 }
 0x314   : > { %v392_v26 = vrot.slane %v391_v24, 2 }
 0x315   : > { %v398_v27 = vrot.slane %v397_v25, 2 }
 0x316   : > { %v393_v28 = vadd.f32 %v392_v26, %v391_v24 }
 0x317   : > { %v399_v29 = vadd.f32 %v398_v27, %v397_v25 }
 0x318   : > { %v394_v30 = vrot.slane %v393_v28, 1 }
 0x319   : > { %v400_v31 = vrot.slane %v399_v29, 1 }
 0x31a   : > { %v395_v32 = vadd.f32 %v394_v30, %v393_v28 }
 0x31b   : > { %v401_v33 = vadd.f32 %v400_v31, %v399_v29 }
 0x31c   : > { %929 = vrcp.f32 %v395_v32 }
 0x31d   : > { %931 = vrcp.f32 %v401_v33 }
 0x322   : > { %v930_v34 = vpop.eup %929 }
 0x323   : > { %v932_v35 = vpop.eup %931  ;;  %v404_v36 = vmul.f32 %v930_v34, %v926_v20 }
 0x324   : > { %v405_v37 = vmul.f32 %v932_v35, %v928_v21 }
 0x326   : > { %v406_v38 = vadd.f32 %v405_v37, %v404_v36 }
 0x328   : > { %407 = vadd.xlane.f32.xlu1 %v406_v38 }
 0x39b   : > { %v408_v39 = vpop.xlane.xlu1 %407 }
 0x39c   : > { %v409_v40 = vmax.f32 %v408_v39, 1e-12 }
 0x39e   : > { %933 = vrcp.f32 %v409_v40 }
 0x3a4   : > { %v934_v41 = vpop.eup %933 }
 0x3a5   : > { %v411_v42 = vmul.f32 %v934_v41, %v404_v36  ;;  %v412_v43 = vmul.f32 %v934_v41, %v405_v37 }
 0x3a7   : > { %429 = vmatmul.f32.vlgmr.msrb.gmra.mxu0 %v411_v42  ;;  %449 = vmatmul.f32.vlgmr.msrb.gmra.mxu1 %v412_v43 }
 0x424   : > { %v430_v44 = vpop.f32.mrf.mxu0  ;;  %v450_v45 = vpop.f32.mrf.mxu1 }
 0x425   : > { %v451_v46 = vadd.f32 %v450_v45, %v430_v44 }
 0x427   : > { %v453_v47 = vmul.f32 %v451_v46, %v451_v46 }
 0x429   : > { %v454_v48 = vsel %vm188_vm0, %v453_v47, 0.0 }
 0x42a   : > { %455 = vadd.xlane.f32.xlu1 %v454_v48 }
 0x49d   : > { %v456_v49 = vpop.xlane.xlu1 %455 }
 0x49e   : > { %v457_v50 = vmax.f32 %v456_v49, 1e-24 }
 0x4a0   : > { %935 = vrsqrt.f32 %v457_v50  ;;  %vm464_vm5 = vweird.f32 %v457_v50 }
 0x4a6   : > { %v936_v51 = vpop.eup %935 }
 0x4a7   : > { %v459_v52 = vmul.f32 %v936_v51, %v457_v50  ;;  %vm465_vm4 = vweird.f32 %v936_v51 }
 0x4a8   : > { %vm466_vm6 = vmor %vm464_vm5, %vm465_vm4 }
 0x4a9   : > { %v460_v53 = vmul.f32 %v936_v51, %v459_v52 }
 0x4ab   : > { %v461_v54 = vmul.f32 0.5, %v460_v53 }
 0x4ad   : > { %v462_v55 = vsub.f32 1.5, %v461_v54 }
 0x4af   : > { %v463_v56 = vmul.f32 %v936_v51, %v462_v55 }
 0x4b1   : > { %v467_v57 = vsel %vm466_vm6, %v936_v51, %v463_v56 }
 0x4b2   : > { %v468_v58 = vmul.f32 %v467_v57, %v451_v46 }
 0x4b4   : > { %834 = vmatmul.msk.f32.vlgmr.msra.gmra.mxu2 %vm188_vm0, %v468_v58  ;;  %835 = vmatmul.msk.f32.vlgmr.msra.gmra.mxu3 %vm188_vm0, %v468_v58 }
 0x537   : > { %v489_v59 = vpop.f32.mrf.mxu2  ;;  %v509_v60 = vpop.f32.mrf.mxu3 }
 0x538   : > { %v512_v61 = vrot.slane %v489_v59, 4  ;;  %v518_v62 = vrot.slane %v509_v60, 4 }
 0x53a   : > { %v513_v63 = vmax.f32 %v489_v59, %v512_v61  ;;  %v519_v0 = vmax.f32 %v509_v60, %v518_v62 }
 0x53c   : > { %v514_v1 = vrot.slane %v513_v63, 2  ;;  %v520_v2 = vrot.slane %v519_v0, 2 }
 0x53e   : > { %v515_v3 = vmax.f32 %v513_v63, %v514_v1  ;;  %v521_v4 = vmax.f32 %v519_v0, %v520_v2 }
 0x540   : > { %v516_v5 = vrot.slane %v515_v3, 1  ;;  %v522_v6 = vrot.slane %v521_v4, 1 }
 0x542   : > { %v517_v7 = vmax.f32 %v515_v3, %v516_v5  ;;  %v523_v8 = vmax.f32 %v521_v4, %v522_v6 }
 0x544   : > { %v524_v9 = vsub.f32 %v489_v59, %v517_v7  ;;  %v525_v10 = vsub.f32 %v509_v60, %v523_v8 }
 0x546   : > { %v526_v11 = vmul.f32 1.442695, %v524_v9  ;;  %v528_v12 = vmul.f32 1.442695, %v525_v10 }
 0x548   : > { %937 = vpow2.f32 %v526_v11 }
 0x549   : > { %939 = vpow2.f32 %v528_v12 }
 0x54e   : > { %v938_v13 = vpop.eup %937 }
 0x54f   : > { %v940_v14 = vpop.eup %939  ;;  %v530_v15 = vrot.slane %v938_v13, 4 }
 0x550   : > { %v536_v16 = vrot.slane %v940_v14, 4 }
 0x551   : > { %v531_v17 = vadd.f32 %v938_v13, %v530_v15 }
 0x552   : > { %v537_v18 = vadd.f32 %v940_v14, %v536_v16 }
 0x553   : > { %v532_v19 = vrot.slane %v531_v17, 2 }
 0x554   : > { %v538_v20 = vrot.slane %v537_v18, 2 }
 0x555   : > { %v533_v21 = vadd.f32 %v532_v19, %v531_v17 }
 0x556   : > { %v539_v22 = vadd.f32 %v538_v20, %v537_v18 }
 0x557   : > { %v534_v23 = vrot.slane %v533_v21, 1 }
 0x558   : > { %v540_v24 = vrot.slane %v539_v22, 1 }
 0x559   : > { %v535_v25 = vadd.f32 %v534_v23, %v533_v21 }
 0x55a   : > { %v541_v26 = vadd.f32 %v540_v24, %v539_v22 }
 0x55b   : > { %941 = vrcp.f32 %v535_v25 }
 0x55c   : > { %943 = vrcp.f32 %v541_v26 }
 0x561   : > { %v942_v27 = vpop.eup %941 }
 0x562   : > { %v944_v28 = vpop.eup %943  ;;  %v544_v29 = vmul.f32 %v942_v27, %v938_v13 }
 0x563   : > { %v545_v30 = vmul.f32 %v944_v28, %v940_v14 }
 0x564   : > { %669 = vmatpush.msra.mxu0 %v544_v29 }
 0x565   : > { %698 = vmatpush.msra.mxu1 %v545_v30  ;;  %v546_v31 = vadd.f32 %v545_v30, %v544_v29 }
 0x567   : > { %547 = vadd.xlane.f32.xlu2 %v546_v31 }
 0x5da   : > { %v548_v32 = vpop.xlane.xlu2 %547 }
 0x5db   : > { %v549_v33 = vmax.f32 %v548_v32, 1e-12 }
 0x5dd   : > { %945 = vrcp.f32 %v549_v33 }
 0x5e3   : > { %v946_v34 = vpop.eup %945 }
 0x5e4   : > { %v551_v35 = vmul.f32 %v946_v34, %v544_v29  ;;  %v552_v36 = vmul.f32 %v946_v34, %v545_v30 }
 0x5e6   : > { %569 = vmatmul.f32.vlgmr.msrb.gmra.mxu2 %v551_v35  ;;  %589 = vmatmul.f32.vlgmr.msrb.gmra.mxu3 %v552_v36 }
 0x669   : > { %v570_v37 = vpop.f32.mrf.mxu2  ;;  %v590_v38 = vpop.f32.mrf.mxu3 }
 0x66a   : > { %v591_v39 = vadd.f32 %v590_v38, %v570_v37 }
 0x66c   : > { %v593_v40 = vmul.f32 %v591_v39, %v591_v39 }
 0x66e   : > { %v594_v41 = vsel %vm188_vm0, %v593_v40, 0.0 }
 0x66f   : > { %595 = vadd.xlane.f32.xlu2 %v594_v41 }
 0x6e2   : > { %v596_v42 = vpop.xlane.xlu2 %595 }
 0x6e3   : > { %v597_v43 = vmax.f32 %v596_v42, 1e-24 }
 0x6e5   : > { %947 = vrsqrt.f32 %v597_v43  ;;  %vm604_vm8 = vweird.f32 %v597_v43 }
 0x6eb   : > { %v948_v44 = vpop.eup %947 }
 0x6ec   : > { %v599_v45 = vmul.f32 %v948_v44, %v597_v43  ;;  %vm605_vm7 = vweird.f32 %v948_v44 }
 0x6ed   : > { %vm606_vm9 = vmor %vm604_vm8, %vm605_vm7 }
 0x6ee   : > { %v600_v46 = vmul.f32 %v948_v44, %v599_v45 }
 0x6f0   : > { %v601_v47 = vmul.f32 0.5, %v600_v46 }
 0x6f2   : > { %v602_v48 = vsub.f32 1.5, %v601_v47 }
 0x6f4   : > { %v603_v49 = vmul.f32 %v948_v44, %v602_v48 }
 0x6f6   : > { %v607_v50 = vsel %vm606_vm9, %v948_v44, %v603_v49 }
 0x6f7   : > { %v608_v51 = vmul.f32 %v607_v50, %v591_v39 }
 0x6f9   : > { %609 = vxpose.xlu0.b32.start.end [1/1] (short) (narrow) %v608_v51, 32 }
 0x79d   : > { %v625_v52 = vpop.trf.xlu0 }
 0x79e   : > { %836 = vmatmul.msk.f32.vlgmr.msra.gmra.mxu0 %vm641_vm10, %v625_v52  ;;  %840 = vmatmul.msk.f32.vlgmr.msra.gmra.mxu1 %vm641_vm10, %v625_v52 }
 0x7a5   : > { %v626_v53 = vpop.trf.xlu0 }
 0x7a6   : > { %837 = vmatmul.msk.f32.gmra.mxu0 %vm641_vm10, %v626_v53  ;;  %841 = vmatmul.msk.f32.gmra.mxu1 %vm641_vm10, %v626_v53 }
 0x7ad   : > { %v627_v54 = vpop.trf.xlu0 }
 0x7ae   : > { %838 = vmatmul.msk.f32.gmra.mxu0 %vm641_vm10, %v627_v54  ;;  %842 = vmatmul.msk.f32.gmra.mxu1 %vm641_vm10, %v627_v54 }
 0x7b5   : > { %v628_v55 = vpop.trf.xlu0 }
 0x7b6   : > { %839 = vmatmul.msk.f32.gmra.mxu0 %vm641_vm10, %v628_v55  ;;  %843 = vmatmul.msk.f32.gmra.mxu1 %vm641_vm10, %v628_v55 }
 0x81b   : > { %v671_v56 = vpop.f32.mrf.mxu0  ;;  %v700_v57 = vpop.f32.mrf.mxu1 }
 0x81c   : > { %712 = vst [vmem:[%s178_s20] sm:$0xff] %v671_v56 }
 0x81d   : > { %713 = vst [vmem:[%s178_s20 + $0x8] sm:$0xff] %v700_v57 }
 0x823   : > { %v674_v58 = vpop.f32.mrf.mxu0  ;;  %v703_v59 = vpop.f32.mrf.mxu1 }
 0x824   : > { %714 = vst [vmem:[%s178_s20 + $0x10] sm:$0xff] %v674_v58 }
 0x825   : > { %715 = vst [vmem:[%s178_s20 + $0x18] sm:$0xff] %v703_v59 }
 0x82b   : > { %v677_v60 = vpop.f32.mrf.mxu0  ;;  %v706_v61 = vpop.f32.mrf.mxu1 }
 0x82c   : > { %716 = vst [vmem:[%s178_s20 + $0x20] sm:$0xff] %v677_v60 }
 0x82d   : > { %717 = vst [vmem:[%s178_s20 + $0x28] sm:$0xff] %v706_v61 }
 0x833   : > { %v680_v62 = vpop.f32.mrf.mxu0  ;;  %v709_v63 = vpop.f32.mrf.mxu1 }
 0x834   : > { %718 = vst [vmem:[%s178_s20 + $0x30] sm:$0xff] %v680_v62 }
 0x835   : > { %719 = vst [vmem:[%s178_s20 + $0x38] sm:$0xff] %v709_v63 }
 0x836   : > { %1036 = shalt.err (!%p1033_p8)
}
 0x837   : > { %s1084_s3 = smov 256   ;;  %s1085_s5 = smov 16  }
 0x838   : > { %857 = dma.vmem_to_hbm [thread:$0]  (%p1153_p11), %s734_s17, 1024, %s736_s24, %s721_s19, %s1084_s3, %s1084_s3, %s1085_s5  }
 0x839 PF: > { %s750_s6 = sand.u32 1, %s1067_s9   ;;  %p1329_p9 = scmp.ge.s32.totalorder %s1079_s12, 2 }
 0x83a   : > { %s751_s7 = scalar_lea.sflag [#allocation4], %s750_s6 }
 0x83b   : > { %p868_p10 = pnand %p1329_p9, %p1157_p12 }
 0x83d   : > { %p869_p1 = pneg %p868_p10 }
 0x83f   : > { %1062 = dma.done.wait (%p869_p1), %s751_s7, 1024  }
 0x840   : > { %1064 = vsyncadd (%p869_p1), %s751_s7, 4294966272  ;;  %p16_p2 = scmp.ge.s32.totalorder %s1126_s15, 4   ;;  %s1330_s9 = smov %s1071_s10 }
 0x841   : > { %s1331_s10 = smov %s1075_s11  ;;  %s1332_s11 = smov %s1138_s18 }
 0x842   : > { %s1333_s12 = smov %s1126_s15  ;;  %18 = sbr.rel (!%p16_p2) target bundleno = 6 (0x6), region = 77 }
 0x847   :  { %757 = vsyncpa [#allocation3], 1 }
 0x848   :  { %759 = vsyncpa [#allocation3 + $0x1], 1 }
 0x849   :  { %760 = vsyncpa [#allocation6], 1 }
 0x84a   :  { %761 = vsyncpa [#allocation4], 1 }
 0x84b   :  { %763 = vsyncpa [#allocation4 + $0x1], 1 }

</bundles_post_ra>
